<compile_context>
chip_gen: v7x
topology: tpu7x:2x2x1
jax: 0.10.0
libtpu: 0.0.40
codegen_flags: <defaults>
</compile_context>

<pallas_src>
import jax
import jax.numpy as jnp
from jax.experimental import pallas as pl
from jax.experimental.pallas import tpu as pltpu

_LANE = 128
_SUBLANE = 8
_TARGET_BLOCK_BYTES = 1 << 20  # ~1 MiB per block (fp32)


def _relu_kernel(x_ref, o_ref):
    # elementwise ReLU on the whole VMEM tile (VPU); scalar 0 avoids a
    # full-tile zeros broadcast.
    o_ref[...] = jnp.maximum(x_ref[...], 0)


def _sigmoid_kernel(x_ref, o_ref):
    # elementwise sigmoid: exp goes to the EUP slot, add/div on the VPU.
    x = x_ref[...]
    o_ref[...] = (1.0 / (1.0 + jnp.exp(-x))).astype(o_ref.dtype)


def _launch_elementwise_2d(kernel_fn, x2d):
    """Tiled, double-buffered launch of an elementwise kernel over a 2-D slab."""
    rows, cols = x2d.shape
    bytes_per_row = cols * jnp.dtype(x2d.dtype).itemsize

    if rows < _SUBLANE:
        tile_r = rows  # full-dim block is allowed even when < 8
    else:
        tile_r = min(rows, max(_SUBLANE, _TARGET_BLOCK_BYTES // bytes_per_row))
        tile_r = max(_SUBLANE, (tile_r // _SUBLANE) * _SUBLANE)

    grid = (pl.cdiv(rows, tile_r),)  # partial last block is masked by Pallas

    return pl.pallas_call(
        kernel_fn,
        out_shape=jax.ShapeDtypeStruct((rows, cols), x2d.dtype),
        grid=grid,
        in_specs=[pl.BlockSpec((tile_r, cols), lambda i: (i, 0))],
        out_specs=pl.BlockSpec((tile_r, cols), lambda i: (i, 0)),
        compiler_params=pltpu.CompilerParams(
            dimension_semantics=("parallel",)  # shard rows across TCs on v7x
        ),
    )(x2d)


def _elementwise_forward(kernel_fn, x):
    orig_shape = x.shape
    n = x.size

    # Widest lane-dense column count that divides n exactly -> no pad/slice.
    cols = None
    for c in (2048, 1024, 512, 256, _LANE):
        if n % c == 0:
            cols = c
            break

    if cols is not None:
        out2d = _launch_elementwise_2d(kernel_fn, x.reshape(n // cols, cols))
        return out2d.reshape(orig_shape)

    # Fallback for element counts not divisible by 128: minimal zero-pad
    # (padded region is sliced away, so it is semantics-preserving); the
    # surrounding jit fuses the pad/slice with neighbouring ops.
    padded_n = pl.cdiv(n, _LANE) * _LANE
    flat = jnp.pad(x.reshape(-1), (0, padded_n - n))
    out2d = _launch_elementwise_2d(kernel_fn, flat.reshape(padded_n // _LANE, _LANE))
    return out2d.reshape(-1)[:n].reshape(orig_shape)


@jax.jit
def tudui_forward(x: jax.Array) -> jax.Array:
    """`Tudui.forward`: ReLU(x) computed in a Pallas TPU kernel."""
    return _elementwise_forward(_relu_kernel, x)


@jax.jit
def tudui2_forward(x: jax.Array) -> jax.Array:
    """`Tudui2.forward`: Sigmoid(x) computed in a Pallas TPU kernel."""
    return _elementwise_forward(_sigmoid_kernel, x)


if __name__ == "__main__":
    key = jax.random.PRNGKey(0)
    # small NCHW input consistent with the module's usage (any shape works)
    x = jax.random.normal(key, (2, 4, 16, 16), dtype=jnp.float32)

    out_relu = jax.block_until_ready(tudui_forward(x))
    out_sig = jax.block_until_ready(tudui2_forward(x))

    # correctness checks against plain-JAX references
    ref_relu = jnp.maximum(x, 0.0)
    ref_sig = jax.nn.sigmoid(x)

    assert out_relu.shape == x.shape and out_relu.dtype == x.dtype
    assert out_sig.shape == x.shape and out_sig.dtype == x.dtype
    assert bool(jnp.allclose(out_relu, ref_relu)), "Pallas ReLU mismatch vs reference"
    assert bool(jnp.allclose(out_sig, ref_sig, rtol=1e-5, atol=1e-6)), (
        "Pallas sigmoid mismatch vs reference"
    )

    print("KERNEL_OK")
</pallas_src>

<mosaic_0001>
module attributes {stable_mosaic.version = 11 : i64} {
  func.func @_relu_kernel(%arg0: i32, %arg1: memref<1x2048xf32, #tpu.memory_space<vmem>>, %arg2: memref<1x2048xf32, #tpu.memory_space<vmem>>) attributes {dimension_semantics = [#tpu.dimension_semantics<parallel>], iteration_bounds = array<i64: 1>, scalar_prefetch = 0 : i64, scratch_operands = 0 : i64, tpu.core_type = #tpu.core_type<tc>, window_params = [{transform_indices = @transform_0, window_bounds = array<i64: 1, 2048>}, {transform_indices = @transform_1, window_bounds = array<i64: 1, 2048>}]} {
    %c0 = arith.constant 0 : index
    %c0_0 = arith.constant 0 : index
    %0 = vector.load %arg1[%c0, %c0_0] : memref<1x2048xf32, #tpu.memory_space<vmem>>, vector<1x2048xf32>
    %cst = arith.constant 0.000000e+00 : f32
    %1 = vector.broadcast %cst : f32 to vector<1x2048xf32>
    %2 = arith.maximumf %0, %1 : vector<1x2048xf32>
    %c0_1 = arith.constant 0 : index
    %c0_2 = arith.constant 0 : index
    %3 = vector.load %arg2[%c0_1, %c0_2] : memref<1x2048xf32, #tpu.memory_space<vmem>>, vector<1x2048xf32>
    tpu.vector_store %arg2[%c0_1, %c0_2], %2 {strides = array<i32>} : memref<1x2048xf32, #tpu.memory_space<vmem>>, vector<1x2048xf32>,
    return
  }
  func.func @transform_0(%arg0: i32) -> (i32, i32) {
    %c0_i32 = arith.constant 0 : i32
    %c0_i32_0 = arith.constant 0 : i32
    return %arg0, %c0_i32 : i32, i32
  }
  func.func @transform_1(%arg0: i32) -> (i32, i32) {
    %c0_i32 = arith.constant 0 : i32
    %c0_i32_0 = arith.constant 0 : i32
    return %arg0, %c0_i32 : i32, i32
  }
}

</mosaic_0001>

<bundles_post_ra>
// kernel: tudui_forward.1
= control target key start
LH: loop header
LB: loop body
LE: loop exit
PB: predicated region body
PF: predicated region fallthrough
CT: control target
= control target key end

     0   :  { %s40_s0 = inlined_call_operand.vmem [shape: f32[1,2048], index: 0, kind: input, shape index: {}]   ;;  %s41_s1 = inlined_call_operand.vmem [shape: f32[1,2048], index: 1, kind: output, shape index: {}]  }
   0x1   :  { %v8_v0 = vld [vmem:[%s40_s0] sm:$0xff]  ;;  %v9_v1 = vld [vmem:[%s40_s0 + $0x8] sm:$0xff] }
   0x2   :  { %v10_v2 = vmax.f32 %v8_v0, 0.0  ;;  %v11_v3 = vmax.f32 %v9_v1, 0.0 }
   0x4   :  { %12 = vst [vmem:[%s41_s1] sm:$0xff] %v10_v2  ;;  %13 = vst [vmem:[%s41_s1 + $0x8] sm:$0xff] %v11_v3 }

</bundles_post_ra>
